<compile_context>
chip_gen: v7x
topology: tpu7x:2x2x1
jax: 0.10.0
libtpu: 0.0.40
codegen_flags: <defaults>
</compile_context>

<pallas_src>
import functools

import jax
import jax.numpy as jnp
from jax.experimental import pallas as pl
from jax.experimental.pallas import tpu as pltpu

HIDDEN = 128      # hidden width of the first Linear / BatchNorm1d
OUT_PAD = 128     # lane-dense padded output width (num_classes <= OUT_PAD)


def classifier2_kernel(x_ref, w1_ref, biases_ref, w2_ref, o_ref):
    # biases_ref: row 0 = (b1 * bn_scale + bn_shift), row 1 = b2 (padded).
    shift_eff = biases_ref[0:1, :]         # (1, 128) static slice
    b2_pad = biases_ref[1:2, :]            # (1, 128) static slice

    # hidden = x @ (W1 * bn_scale) + shift_eff
    h = jnp.dot(x_ref[...], w1_ref[...], preferred_element_type=jnp.float32)
    h = h + shift_eff                      # (TB,128) + (1,128)
    # ReLU (Dropout p=0.0 is identity)
    h = jnp.maximum(h, 0.0)
    # output = h @ W2_pad + b2_pad  (lane-dense, padded to 128 cols)
    out = jnp.dot(h, w2_ref[...], preferred_element_type=jnp.float32)
    out = out + b2_pad                     # (TB,128) + (1,128)
    o_ref[...] = out.astype(o_ref.dtype)


def _round_up(x, m):
    return ((x + m - 1) // m) * m


@functools.partial(jax.jit, static_argnames=("eps",))
def classifier2_forward(x, params, eps=1e-5):
    """x: (B, in_dim) float32.  params: dict of Classifier2 parameters."""
    B, in_dim = x.shape
    num_classes = params["w2"].shape[1]
    assert params["w1"].shape == (in_dim, HIDDEN)
    assert num_classes <= OUT_PAD

    # ---- Fold BN (inference) + b1 into the first layer (one-time XLA cost) ----
    scale = params["gamma"] / jnp.sqrt(params["running_var"] + eps)   # (128,)
    shift = params["beta"] - params["running_mean"] * scale           # (128,)
    w1_eff = params["w1"] * scale[None, :]                            # (in_dim,128)
    shift_eff = params["b1"] * scale + shift                          # (128,)

    # ---- Lane-dense output: zero-pad W2 / b2 to OUT_PAD columns ----
    w2_pad = jnp.zeros((HIDDEN, OUT_PAD), jnp.float32).at[:, :num_classes].set(
        params["w2"])
    b2_pad = jnp.zeros((OUT_PAD,), jnp.float32).at[:num_classes].set(params["b2"])

    # Stack the two bias rows into one small VMEM-resident tensor.
    biases = jnp.stack([shift_eff, b2_pad], axis=0)                   # (2, 128)

    # ---- Batch tiling (sized for v7x's 64 MiB VMEM; fine on v5e/v6e too) ----
    TB = min(512, _round_up(B, 8))
    B_pad = _round_up(B, TB)
    if B_pad != B:
        x = jnp.pad(x, ((0, B_pad - B), (0, 0)))
    grid = (B_pad // TB,)

    # VMEM budget: double-buffered x/out tiles + (double-buffered) resident params.
    vmem_bytes = 4 * (
        2 * TB * in_dim                # x tiles
        + 2 * TB * OUT_PAD             # out tiles
        + 2 * (in_dim * HIDDEN + 2 * HIDDEN + HIDDEN * OUT_PAD)       # params
    )
    vmem_limit = min(vmem_bytes + (4 << 20), 100 << 20)

    cost = pl.CostEstimate(
        flops=2 * B_pad * (in_dim * HIDDEN + HIDDEN * OUT_PAD),
        transcendentals=0,
        bytes_accessed=4 * (B_pad * in_dim + in_dim * HIDDEN
                            + HIDDEN * OUT_PAD + 2 * HIDDEN + B_pad * OUT_PAD),
    )

    out = pl.pallas_call(
        classifier2_kernel,
        out_shape=jax.ShapeDtypeStruct((B_pad, OUT_PAD), jnp.float32),
        grid_spec=pltpu.PrefetchScalarGridSpec(
            num_scalar_prefetch=0,
            grid=grid,
            in_specs=[
                pl.BlockSpec((TB, in_dim), lambda i: (i, 0)),        # x tile
                pl.BlockSpec((in_dim, HIDDEN), lambda i: (0, 0)),    # w1_eff
                pl.BlockSpec((2, HIDDEN), lambda i: (0, 0)),         # biases
                pl.BlockSpec((HIDDEN, OUT_PAD), lambda i: (0, 0)),   # w2_pad
            ],
            out_specs=pl.BlockSpec((TB, OUT_PAD), lambda i: (i, 0)),
        ),
        compiler_params=pltpu.CompilerParams(
            dimension_semantics=("parallel",),
            vmem_limit_bytes=vmem_limit,
        ),
        cost_estimate=cost,
    )(x, w1_eff, biases, w2_pad)

    return out[:B, :num_classes]


def init_params(key, in_dim, hidden=HIDDEN, num_classes=2):
    k1, k2, k3, k4 = jax.random.split(key, 4)
    # PyTorch nn.Linear default init: U(-1/sqrt(fan_in), 1/sqrt(fan_in))
    bound1 = 1.0 / jnp.sqrt(in_dim)
    bound2 = 1.0 / jnp.sqrt(hidden)
    return {
        "w1": jax.random.uniform(k1, (in_dim, hidden), jnp.float32, -bound1, bound1),
        "b1": jax.random.uniform(k2, (hidden,), jnp.float32, -bound1, bound1),
        "gamma": jnp.ones((hidden,), jnp.float32),
        "beta": jnp.zeros((hidden,), jnp.float32),
        "running_mean": jnp.zeros((hidden,), jnp.float32),
        "running_var": jnp.ones((hidden,), jnp.float32),
        "w2": jax.random.uniform(k3, (hidden, num_classes), jnp.float32, -bound2, bound2),
        "b2": jax.random.uniform(k4, (num_classes,), jnp.float32, -bound2, bound2),
    }


if __name__ == "__main__":
    key = jax.random.PRNGKey(0)
    kx, kp = jax.random.split(key)

    B, in_dim, num_classes = 8, 32, 2
    x = jax.random.normal(kx, (B, in_dim), jnp.float32)
    params = init_params(kp, in_dim, hidden=HIDDEN, num_classes=num_classes)

    out = classifier2_forward(x, params)
    out = jax.block_until_ready(out)

    # Reference in plain JAX (same math, inference-mode BN, p=0 dropout).
    eps = 1e-5
    h = x @ params["w1"] + params["b1"]
    h = (h - params["running_mean"]) / jnp.sqrt(params["running_var"] + eps)
    h = h * params["gamma"] + params["beta"]
    h = jnp.maximum(h, 0.0)
    ref = h @ params["w2"] + params["b2"]

    assert out.shape == (B, num_classes)
    assert jnp.allclose(out, ref, atol=1e-4, rtol=1e-4), (
        float(jnp.max(jnp.abs(out - ref))))

    print("KERNEL_OK")
</pallas_src>

<mosaic_0001>
module attributes {stable_mosaic.version = 11 : i64} {
  func.func @classifier2_kernel(%arg0: i32, %arg1: memref<8x32xf32, #tpu.memory_space<vmem>>, %arg2: memref<32x128xf32, #tpu.memory_space<vmem>>, %arg3: memref<2x128xf32, #tpu.memory_space<vmem>>, %arg4: memref<128x128xf32, #tpu.memory_space<vmem>>, %arg5: memref<8x128xf32, #tpu.memory_space<vmem>>) attributes {dimension_semantics = [#tpu.dimension_semantics<parallel>], iteration_bounds = array<i64: 1>, scalar_prefetch = 0 : i64, scratch_operands = 0 : i64, tpu.core_type = #tpu.core_type<tc>, window_params = [{transform_indices = @transform_0, window_bounds = array<i64: 8, 32>}, {pipeline_mode = #tpu.pipeline_mode<synchronous>, transform_indices = @transform_1, window_bounds = array<i64: 32, 128>}, {pipeline_mode = #tpu.pipeline_mode<synchronous>, transform_indices = @transform_2, window_bounds = array<i64: 2, 128>}, {pipeline_mode = #tpu.pipeline_mode<synchronous>, transform_indices = @transform_3, window_bounds = array<i64: 128, 128>}, {transform_indices = @transform_4, window_bounds = array<i64: 8, 128>}]} {
    %c0 = arith.constant 0 : index
    %c0_0 = arith.constant 0 : index
    %0 = vector.load %arg3[%c0, %c0_0] : memref<2x128xf32, #tpu.memory_space<vmem>>, vector<1x128xf32>
    %c1 = arith.constant 1 : index
    %c0_1 = arith.constant 0 : index
    %1 = vector.load %arg3[%c1, %c0_1] : memref<2x128xf32, #tpu.memory_space<vmem>>, vector<1x128xf32>
    %c0_2 = arith.constant 0 : index
    %c0_3 = arith.constant 0 : index
    %2 = vector.load %arg1[%c0_2, %c0_3] : memref<8x32xf32, #tpu.memory_space<vmem>>, vector<8x32xf32>
    %c0_4 = arith.constant 0 : index
    %c0_5 = arith.constant 0 : index
    %3 = vector.load %arg2[%c0_4, %c0_5] : memref<32x128xf32, #tpu.memory_space<vmem>>, vector<32x128xf32>
    %cst = arith.constant dense<0.000000e+00> : vector<8x128xf32>
    %4 = tpu.matmul %2, %3, %cst {dimension_numbers = #tpu.dot_dimension_numbers<[1], [0], [0], [1], [0, 0, 1, 1], [], []>} : vector<8x32xf32>, vector<32x128xf32>, vector<8x128xf32> -> vector<8x128xf32>
    %5 = vector.broadcast %0 : vector<1x128xf32> to vector<8x128xf32>
    %6 = arith.addf %4, %5 : vector<8x128xf32>
    %cst_6 = arith.constant 0.000000e+00 : f32
    %7 = vector.broadcast %cst_6 : f32 to vector<8x128xf32>
    %8 = arith.maximumf %6, %7 : vector<8x128xf32>
    %c0_7 = arith.constant 0 : index
    %c0_8 = arith.constant 0 : index
    %9 = vector.load %arg4[%c0_7, %c0_8] : memref<128x128xf32, #tpu.memory_space<vmem>>, vector<128x128xf32>
    %cst_9 = arith.constant dense<0.000000e+00> : vector<8x128xf32>
    %10 = tpu.matmul %8, %9, %cst_9 {dimension_numbers = #tpu.dot_dimension_numbers<[1], [0], [0], [1], [0, 0, 1, 1], [], []>} : vector<8x128xf32>, vector<128x128xf32>, vector<8x128xf32> -> vector<8x128xf32>
    %11 = vector.broadcast %1 : vector<1x128xf32> to vector<8x128xf32>
    %12 = arith.addf %10, %11 : vector<8x128xf32>
    %c0_10 = arith.constant 0 : index
    %c0_11 = arith.constant 0 : index
    %13 = vector.load %arg5[%c0_10, %c0_11] : memref<8x128xf32, #tpu.memory_space<vmem>>, vector<8x128xf32>
    tpu.vector_store %arg5[%c0_10, %c0_11], %12 {strides = array<i32>} : memref<8x128xf32, #tpu.memory_space<vmem>>, vector<8x128xf32>,
    return
  }
  func.func @transform_0(%arg0: i32) -> (i32, i32) {
    %c0_i32 = arith.constant 0 : i32
    %c0_i32_0 = arith.constant 0 : i32
    return %arg0, %c0_i32 : i32, i32
  }
  func.func @transform_1(%arg0: i32) -> (i32, i32) {
    %c0_i32 = arith.constant 0 : i32
    %c0_i32_0 = arith.constant 0 : i32
    %c0_i32_1 = arith.constant 0 : i32
    return %c0_i32, %c0_i32_0 : i32, i32
  }
  func.func @transform_2(%arg0: i32) -> (i32, i32) {
    %c0_i32 = arith.constant 0 : i32
    %c0_i32_0 = arith.constant 0 : i32
    %c0_i32_1 = arith.constant 0 : i32
    return %c0_i32, %c0_i32_0 : i32, i32
  }
  func.func @transform_3(%arg0: i32) -> (i32, i32) {
    %c0_i32 = arith.constant 0 : i32
    %c0_i32_0 = arith.constant 0 : i32
    %c0_i32_1 = arith.constant 0 : i32
    return %c0_i32, %c0_i32_0 : i32, i32
  }
  func.func @transform_4(%arg0: i32) -> (i32, i32) {
    %c0_i32 = arith.constant 0 : i32
    %c0_i32_0 = arith.constant 0 : i32
    return %arg0, %c0_i32 : i32, i32
  }
}

</mosaic_0001>

<bundles_post_ra>
// kernel: classifier2_forward.1
= control target key start
LH: loop header
LB: loop body
LE: loop exit
PB: predicated region body
PF: predicated region fallthrough
CT: control target
= control target key end

     0   :  { %v302_v0 = vmov 0.0|0.0   ;;  %vm303_vm0 = vmmov 0   ;;  %v304_v4 = vmov 0.0   ;;  %vm28_vm1 = vcmask 261120   ;;  %s402_s1 = inlined_call_operand.vmem [shape: f32[32,128], index: 1, kind: input, shape index: {}]   ;;  %s403_s3 = inlined_call_operand.vmem [shape: f32[128,128], index: 3, kind: input, shape index: {}]   ;;  %s404_s0 = inlined_call_operand.vmem [shape: f32[8,32], index: 0, kind: input, shape index: {}]   ;;  %s405_s2 = inlined_call_operand.vmem [shape: f32[2,128], index: 2, kind: input, shape index: {}]   ;;  %s406_s4 = inlined_call_operand.vmem [shape: f32[8,128], index: 4, kind: output, shape index: {}]  }
   0x1   :  { %269 = vmatprep.subr.bf16.mxu0 %v302_v0  ;;  %v20_v1 = vld [vmem:[%s402_s1] sm:$0xff]  ;;  %v21_v2 = vld [vmem:[%s402_s1 + $0x8] sm:$0xff]  ;;  %v22_v3 = vld [vmem:[%s402_s1 + $0x10] sm:$0xff]  ;;  %231 = vmatprep.mubr.msk.f32.mxu0 %vm303_vm0, %v304_v4 }
   0x2   :  { %v270_v5 = vpack.c.bf16 %v21_v2, %v20_v1  ;;  %v23_v6 = vld [vmem:[%s402_s1 + $0x18] sm:$0xff]  ;;  %275 = vmatprep.subr.bf16.mxu1 %v302_v0  ;;  %v103_v7 = vld [vmem:[%s403_s3] sm:$0xff]  ;;  %266 = vmatprep.mubr.msk.f32.mxu1 %vm303_vm0, %v304_v4  ;;  %v104_v8 = vld [vmem:[%s403_s3 + $0x8] sm:$0xff] }
   0x3   :  { %v105_v9 = vld [vmem:[%s403_s3 + $0x10] sm:$0xff]  ;;  %v106_v10 = vld [vmem:[%s403_s3 + $0x18] sm:$0xff]  ;;  %v273_v11 = vpack.c.bf16 %v23_v6, %v22_v3  ;;  %v276_v12 = vpack.c.bf16 %v104_v8, %v103_v7  ;;  %v107_v14 = vld [vmem:[%s403_s3 + $0x20] sm:$0xff] }
   0x4   :  { %271 = vmatpush3.bf16.msra.mxu0 %v270_v5  ;;  %v279_v13 = vpack.c.bf16 %v106_v10, %v105_v9  ;;  %v108_v15 = vld [vmem:[%s403_s3 + $0x28] sm:$0xff]  ;;  %v19_v16 = vld [vmem:[%s404_s0] sm:$0xff]  ;;  %v109_v18 = vld [vmem:[%s403_s3 + $0x30] sm:$0xff] }
   0x5   :  { %272 = vmatprep.subr.bf16.mxu0 %v302_v0  ;;  %277 = vmatpush3.bf16.msra.mxu1 %v276_v12  ;;  %v282_v17 = vpack.c.bf16 %v108_v15, %v107_v14  ;;  %v110_v19 = vld [vmem:[%s403_s3 + $0x38] sm:$0xff]  ;;  %v111_v21 = vld [vmem:[%s403_s3 + $0x40] sm:$0xff]  ;;  %v112_v22 = vld [vmem:[%s403_s3 + $0x48] sm:$0xff] }
   0x6   :  { %278 = vmatprep.subr.bf16.mxu1 %v302_v0  ;;  %v285_v20 = vpack.c.bf16 %v110_v19, %v109_v18  ;;  %v288_v23 = vpack.c.bf16 %v112_v22, %v111_v21  ;;  %v113_v24 = vld [vmem:[%s403_s3 + $0x50] sm:$0xff]  ;;  %v114_v25 = vld [vmem:[%s403_s3 + $0x58] sm:$0xff]  ;;  %v115_v27 = vld [vmem:[%s403_s3 + $0x60] sm:$0xff] }
   0x7   :  { %v291_v26 = vpack.c.bf16 %v114_v25, %v113_v24  ;;  %v116_v28 = vld [vmem:[%s403_s3 + $0x68] sm:$0xff]  ;;  %v117_v30 = vld [vmem:[%s403_s3 + $0x70] sm:$0xff]  ;;  %v118_v31 = vld [vmem:[%s403_s3 + $0x78] sm:$0xff] }
   0x8   :  { %274 = vmatpush3.bf16.msra.mxu0 %v273_v11  ;;  %v294_v29 = vpack.c.bf16 %v116_v28, %v115_v27  ;;  %v297_v32 = vpack.c.bf16 %v118_v31, %v117_v30  ;;  %v198_v33 = vld [vmem:[%s405_s2] ss:$0 sm:$0xff]  ;;  %v200_v38 = vld [vmem:[%s405_s2 + $0x1] ss:$0 sm:$0xff] }
   0x9   :  { %280 = vmatpush3.bf16.msra.mxu1 %v279_v13 }
   0xa   :  { %281 = vmatprep.subr.bf16.mxu1 %v302_v0 }
   0xb   :  { %232 = vmatmul.mubr.msk.f32.vlgmr.msra.gmra.mrb[0].mxu0 %vm28_vm1, %v19_v16 }
   0xd   :  { %283 = vmatpush3.bf16.msra.mxu1 %v282_v17 }
   0xe   :  { %284 = vmatprep.subr.bf16.mxu1 %v302_v0 }
  0x11   :  { %286 = vmatpush3.bf16.msra.mxu1 %v285_v20 }
  0x12   :  { %287 = vmatprep.subr.bf16.mxu1 %v302_v0 }
  0x15   :  { %289 = vmatpush3.bf16.msra.mxu1 %v288_v23 }
  0x16   :  { %290 = vmatprep.subr.bf16.mxu1 %v302_v0 }
  0x19   :  { %292 = vmatpush3.bf16.msra.mxu1 %v291_v26 }
  0x1a   :  { %293 = vmatprep.subr.bf16.mxu1 %v302_v0 }
  0x1d   :  { %295 = vmatpush3.bf16.msra.mxu1 %v294_v29 }
  0x1e   :  { %296 = vmatprep.subr.bf16.mxu1 %v302_v0 }
  0x21   :  { %298 = vmatpush3.bf16.msra.mxu1 %v297_v32 }
  0xde   :  { %v98_v34 = vpop.f32.mrb[0].mxu0 }
  0xdf   :  { %v99_v35 = vadd.f32 %v198_v33, %v98_v34  ;;  %v233_v36 = vpop.f32.mrb[1].mxu0 }
  0xe1   :  { %v102_v37 = vmax.f32 %v99_v35, 0.0 }
  0xe3   :  { %267 = vmatmul.mubr.f32.vlgmr.msra.gmra.mrb[0].mxu1 %v102_v37 }
 0x1b6   :  { %v189_v39 = vpop.f32.mrb[0].mxu1 }
 0x1b7   :  { %v190_v40 = vadd.f32 %v200_v38, %v189_v39  ;;  %v268_v41 = vpop.f32.mrb[1].mxu1 }
 0x1b9   :  { %193 = vst [vmem:[%s406_s4] sm:$0xff] %v190_v40 }

</bundles_post_ra>
